<compile_context>
chip_gen: v7x
topology: tpu7x:2x2x1
jax: 0.10.0
libtpu: 0.0.40
codegen_flags: <defaults>
</compile_context>

<pallas_src>
import jax
import jax.numpy as jnp
from jax import lax
from jax.experimental import pallas as pl
from jax.experimental.pallas import tpu as pltpu

INPUT_FEATURES = 12
HDN_DIM = 30
OUT_FEATURES = 2

MAX_TILE_B = 2048   # sweepable; even 8192 is only ~0.8 MB of double-buffered input


def mlp_kernel(x_ref,
               w1_ref, b1_ref,
               w2_ref, b2_ref,
               w3_ref, b3_ref,
               w4_ref, b4_ref,
               w5_ref, b5_ref,
               out_ref):
    # x_ref:   (TILE_B, INPUT_FEATURES)  -- original (batch, features) layout
    # w*_ref:  (out, in)                 -- PyTorch nn.Linear weight layout
    # b*_ref:  (out, 1)                  -- broadcasts along lanes (batch)
    # out_ref: (OUT_FEATURES, TILE_B)    -- batch-in-lanes, lane-dense stores

    # Layer 1: h = W1 @ x^T, expressed as a minor-minor contraction so the
    # (TILE_B, 12) tile never needs a separate transpose (in-kernel or in XLA).
    h = lax.dot_general(
        w1_ref[...], x_ref[...],
        dimension_numbers=(((1,), (1,)), ((), ())),
        preferred_element_type=jnp.float32) + b1_ref[...]
    h = jnp.maximum(h, 0.0)                       # Dropout (eval) -> identity; ReLU

    # Hidden layers: one full-width (30, TILE_B) chain; Mosaic chunks the lane
    # dimension itself so the full MXU width is used on every generation.
    h = jnp.maximum(
        jnp.dot(w2_ref[...], h, preferred_element_type=jnp.float32) + b2_ref[...], 0.0)
    h = jnp.maximum(
        jnp.dot(w3_ref[...], h, preferred_element_type=jnp.float32) + b3_ref[...], 0.0)
    h = jnp.maximum(
        jnp.dot(w4_ref[...], h, preferred_element_type=jnp.float32) + b4_ref[...], 0.0)
    out = jnp.dot(w5_ref[...], h, preferred_element_type=jnp.float32) + b5_ref[...]

    out_ref[...] = out.astype(out_ref.dtype)


def _pick_tile_b(batch, max_tile=MAX_TILE_B):
    """Large tiles (overhead amortization) but >= 2 grid steps when possible (v7x)."""
    full = 128 * pl.cdiv(batch, 128)
    if full <= 256:
        return int(full)                      # tiny batches: a single small tile
    two_way = 128 * pl.cdiv(pl.cdiv(batch, 2), 128)
    return int(min(max_tile, two_way))


def init_params(key, in_f=INPUT_FEATURES, hdn=HDN_DIM, out_f=OUT_FEATURES):
    """PyTorch-style init. Weights stored as (out, in) (nn.Linear layout), biases as (out, 1)."""
    dims = [(in_f, hdn), (hdn, hdn), (hdn, hdn), (hdn, hdn), (hdn, out_f)]
    params = []
    for i, (din, dout) in enumerate(dims):
        kw, kb = jax.random.split(jax.random.fold_in(key, i))
        bound = 1.0 / (float(din) ** 0.5)
        w = jax.random.uniform(kw, (dout, din), jnp.float32, -bound, bound)
        b = jax.random.uniform(kb, (dout, 1), jnp.float32, -bound, bound)
        params.append((w, b))
    return params


def ann_model_forward(x, params, tile_b=None):
    """x: (B, INPUT_FEATURES) float32 -> (B, OUT_FEATURES) float32 (eval-mode forward)."""
    B = x.shape[0]
    if tile_b is None:
        tile_b = _pick_tile_b(B)
    n_tiles = pl.cdiv(B, tile_b)

    flat_args = [x.astype(jnp.float32)]
    in_specs = [pl.BlockSpec((tile_b, INPUT_FEATURES), lambda i: (i, 0))]
    const_map = lambda i: (0, 0)  # parameters: fetched once, resident in VMEM
    for w, b in params:
        flat_args.append(w)
        flat_args.append(b)
        in_specs.append(pl.BlockSpec(w.shape, const_map))
        in_specs.append(pl.BlockSpec(b.shape, const_map))

    out_t = pl.pallas_call(
        mlp_kernel,
        grid=(n_tiles,),
        out_shape=jax.ShapeDtypeStruct((OUT_FEATURES, B), jnp.float32),
        in_specs=in_specs,
        out_specs=pl.BlockSpec((OUT_FEATURES, tile_b), lambda i: (0, i)),
        compiler_params=pltpu.CompilerParams(
            dimension_semantics=("parallel",)),
    )(*flat_args)

    # (OUT_FEATURES, B) -> (B, OUT_FEATURES); trivial (2*B elements).
    return out_t.T


def ann_model_reference(x, params):
    h = x
    for i, (w, b) in enumerate(params):
        h = jnp.dot(h, w.T, preferred_element_type=jnp.float32) + b[:, 0]
        if i < len(params) - 1:
            h = jnp.maximum(h, 0.0)
    return h


if __name__ == "__main__":
    key = jax.random.PRNGKey(0)
    kx, kp = jax.random.split(key)

    batch = 300  # not a lane multiple: exercises >1 grid step and the ragged last block
    x = jax.random.normal(kx, (batch, INPUT_FEATURES), jnp.float32)
    params = init_params(kp)

    out = jax.block_until_ready(ann_model_forward(x, params))
    ref = ann_model_reference(x, params)

    assert out.shape == (batch, OUT_FEATURES), out.shape
    assert jnp.allclose(out, ref, atol=1e-3, rtol=1e-3), "mismatch vs pure-JAX reference"

    print("KERNEL_OK")
</pallas_src>

<mosaic_0001>
module attributes {stable_mosaic.version = 11 : i64} {
  func.func @mlp_kernel(%arg0: i32, %arg1: memref<256x12xf32, #tpu.memory_space<vmem>>, %arg2: memref<30x12xf32, #tpu.memory_space<vmem>>, %arg3: memref<30x1xf32, #tpu.memory_space<vmem>>, %arg4: memref<30x30xf32, #tpu.memory_space<vmem>>, %arg5: memref<30x1xf32, #tpu.memory_space<vmem>>, %arg6: memref<30x30xf32, #tpu.memory_space<vmem>>, %arg7: memref<30x1xf32, #tpu.memory_space<vmem>>, %arg8: memref<30x30xf32, #tpu.memory_space<vmem>>, %arg9: memref<30x1xf32, #tpu.memory_space<vmem>>, %arg10: memref<2x30xf32, #tpu.memory_space<vmem>>, %arg11: memref<2x1xf32, #tpu.memory_space<vmem>>, %arg12: memref<2x256xf32, #tpu.memory_space<vmem>>) attributes {dimension_semantics = [#tpu.dimension_semantics<parallel>], iteration_bounds = array<i64: 2>, scalar_prefetch = 0 : i64, scratch_operands = 0 : i64, tpu.core_type = #tpu.core_type<tc>, window_params = [{transform_indices = @transform_0, window_bounds = array<i64: 256, 12>}, {pipeline_mode = #tpu.pipeline_mode<synchronous>, transform_indices = @transform_1, window_bounds = array<i64: 30, 12>}, {pipeline_mode = #tpu.pipeline_mode<synchronous>, transform_indices = @transform_2, window_bounds = array<i64: 30, 1>}, {pipeline_mode = #tpu.pipeline_mode<synchronous>, transform_indices = @transform_3, window_bounds = array<i64: 30, 30>}, {pipeline_mode = #tpu.pipeline_mode<synchronous>, transform_indices = @transform_4, window_bounds = array<i64: 30, 1>}, {pipeline_mode = #tpu.pipeline_mode<synchronous>, transform_indices = @transform_5, window_bounds = array<i64: 30, 30>}, {pipeline_mode = #tpu.pipeline_mode<synchronous>, transform_indices = @transform_6, window_bounds = array<i64: 30, 1>}, {pipeline_mode = #tpu.pipeline_mode<synchronous>, transform_indices = @transform_7, window_bounds = array<i64: 30, 30>}, {pipeline_mode = #tpu.pipeline_mode<synchronous>, transform_indices = @transform_8, window_bounds = array<i64: 30, 1>}, {pipeline_mode = #tpu.pipeline_mode<synchronous>, transform_indices = @transform_9, window_bounds = array<i64: 2, 30>}, {pipeline_mode = #tpu.pipeline_mode<synchronous>, transform_indices = @transform_10, window_bounds = array<i64: 2, 1>}, {transform_indices = @transform_11, window_bounds = array<i64: 2, 256>}]} {
    %c0 = arith.constant 0 : index
    %c0_0 = arith.constant 0 : index
    %0 = vector.load %arg2[%c0, %c0_0] : memref<30x12xf32, #tpu.memory_space<vmem>>, vector<30x12xf32>
    %c0_1 = arith.constant 0 : index
    %c0_2 = arith.constant 0 : index
    %1 = vector.load %arg1[%c0_1, %c0_2] : memref<256x12xf32, #tpu.memory_space<vmem>>, vector<256x12xf32>
    %cst = arith.constant dense<0.000000e+00> : vector<30x256xf32>
    %2 = tpu.matmul %0, %1, %cst {dimension_numbers = #tpu.dot_dimension_numbers<[1], [1], [0], [0], [0, 0, 1, 0], [], []>} : vector<30x12xf32>, vector<256x12xf32>, vector<30x256xf32> -> vector<30x256xf32>
    %c0_3 = arith.constant 0 : index
    %c0_4 = arith.constant 0 : index
    %3 = vector.load %arg3[%c0_3, %c0_4] : memref<30x1xf32, #tpu.memory_space<vmem>>, vector<30x1xf32>
    %4 = vector.broadcast %3 : vector<30x1xf32> to vector<30x256xf32>
    %5 = arith.addf %2, %4 : vector<30x256xf32>
    %cst_5 = arith.constant 0.000000e+00 : f32
    %6 = vector.broadcast %cst_5 : f32 to vector<30x256xf32>
    %7 = arith.maximumf %5, %6 : vector<30x256xf32>
    %c0_6 = arith.constant 0 : index
    %c0_7 = arith.constant 0 : index
    %8 = vector.load %arg4[%c0_6, %c0_7] : memref<30x30xf32, #tpu.memory_space<vmem>>, vector<30x30xf32>
    %cst_8 = arith.constant dense<0.000000e+00> : vector<30x256xf32>
    %9 = tpu.matmul %8, %7, %cst_8 {dimension_numbers = #tpu.dot_dimension_numbers<[1], [0], [0], [1], [0, 0, 1, 1], [], []>} : vector<30x30xf32>, vector<30x256xf32>, vector<30x256xf32> -> vector<30x256xf32>
    %c0_9 = arith.constant 0 : index
    %c0_10 = arith.constant 0 : index
    %10 = vector.load %arg5[%c0_9, %c0_10] : memref<30x1xf32, #tpu.memory_space<vmem>>, vector<30x1xf32>
    %11 = vector.broadcast %10 : vector<30x1xf32> to vector<30x256xf32>
    %12 = arith.addf %9, %11 : vector<30x256xf32>
    %cst_11 = arith.constant 0.000000e+00 : f32
    %13 = vector.broadcast %cst_11 : f32 to vector<30x256xf32>
    %14 = arith.maximumf %12, %13 : vector<30x256xf32>
    %c0_12 = arith.constant 0 : index
    %c0_13 = arith.constant 0 : index
    %15 = vector.load %arg6[%c0_12, %c0_13] : memref<30x30xf32, #tpu.memory_space<vmem>>, vector<30x30xf32>
    %cst_14 = arith.constant dense<0.000000e+00> : vector<30x256xf32>
    %16 = tpu.matmul %15, %14, %cst_14 {dimension_numbers = #tpu.dot_dimension_numbers<[1], [0], [0], [1], [0, 0, 1, 1], [], []>} : vector<30x30xf32>, vector<30x256xf32>, vector<30x256xf32> -> vector<30x256xf32>
    %c0_15 = arith.constant 0 : index
    %c0_16 = arith.constant 0 : index
    %17 = vector.load %arg7[%c0_15, %c0_16] : memref<30x1xf32, #tpu.memory_space<vmem>>, vector<30x1xf32>
    %18 = vector.broadcast %17 : vector<30x1xf32> to vector<30x256xf32>
    %19 = arith.addf %16, %18 : vector<30x256xf32>
    %cst_17 = arith.constant 0.000000e+00 : f32
    %20 = vector.broadcast %cst_17 : f32 to vector<30x256xf32>
    %21 = arith.maximumf %19, %20 : vector<30x256xf32>
    %c0_18 = arith.constant 0 : index
    %c0_19 = arith.constant 0 : index
    %22 = vector.load %arg8[%c0_18, %c0_19] : memref<30x30xf32, #tpu.memory_space<vmem>>, vector<30x30xf32>
    %cst_20 = arith.constant dense<0.000000e+00> : vector<30x256xf32>
    %23 = tpu.matmul %22, %21, %cst_20 {dimension_numbers = #tpu.dot_dimension_numbers<[1], [0], [0], [1], [0, 0, 1, 1], [], []>} : vector<30x30xf32>, vector<30x256xf32>, vector<30x256xf32> -> vector<30x256xf32>
    %c0_21 = arith.constant 0 : index
    %c0_22 = arith.constant 0 : index
    %24 = vector.load %arg9[%c0_21, %c0_22] : memref<30x1xf32, #tpu.memory_space<vmem>>, vector<30x1xf32>
    %25 = vector.broadcast %24 : vector<30x1xf32> to vector<30x256xf32>
    %26 = arith.addf %23, %25 : vector<30x256xf32>
    %cst_23 = arith.constant 0.000000e+00 : f32
    %27 = vector.broadcast %cst_23 : f32 to vector<30x256xf32>
    %28 = arith.maximumf %26, %27 : vector<30x256xf32>
    %c0_24 = arith.constant 0 : index
    %c0_25 = arith.constant 0 : index
    %29 = vector.load %arg10[%c0_24, %c0_25] : memref<2x30xf32, #tpu.memory_space<vmem>>, vector<2x30xf32>
    %cst_26 = arith.constant dense<0.000000e+00> : vector<2x256xf32>
    %30 = tpu.matmul %29, %28, %cst_26 {dimension_numbers = #tpu.dot_dimension_numbers<[1], [0], [0], [1], [0, 0, 1, 1], [], []>} : vector<2x30xf32>, vector<30x256xf32>, vector<2x256xf32> -> vector<2x256xf32>
    %c0_27 = arith.constant 0 : index
    %c0_28 = arith.constant 0 : index
    %31 = vector.load %arg11[%c0_27, %c0_28] : memref<2x1xf32, #tpu.memory_space<vmem>>, vector<2x1xf32>
    %32 = vector.broadcast %31 : vector<2x1xf32> to vector<2x256xf32>
    %33 = arith.addf %30, %32 : vector<2x256xf32>
    %c0_29 = arith.constant 0 : index
    %c0_30 = arith.constant 0 : index
    %34 = vector.load %arg12[%c0_29, %c0_30] : memref<2x256xf32, #tpu.memory_space<vmem>>, vector<2x256xf32>
    tpu.vector_store %arg12[%c0_29, %c0_30], %33 {strides = array<i32>} : memref<2x256xf32, #tpu.memory_space<vmem>>, vector<2x256xf32>,
    return
  }
  func.func @transform_0(%arg0: i32) -> (i32, i32) {
    %c0_i32 = arith.constant 0 : i32
    %c0_i32_0 = arith.constant 0 : i32
    return %arg0, %c0_i32 : i32, i32
  }
  func.func @transform_1(%arg0: i32) -> (i32, i32) {
    %c0_i32 = arith.constant 0 : i32
    %c0_i32_0 = arith.constant 0 : i32
    %c0_i32_1 = arith.constant 0 : i32
    return %c0_i32, %c0_i32_0 : i32, i32
  }
  func.func @transform_2(%arg0: i32) -> (i32, i32) {
    %c0_i32 = arith.constant 0 : i32
    %c0_i32_0 = arith.constant 0 : i32
    %c0_i32_1 = arith.constant 0 : i32
    return %c0_i32, %c0_i32_0 : i32, i32
  }
  func.func @transform_3(%arg0: i32) -> (i32, i32) {
    %c0_i32 = arith.constant 0 : i32
    %c0_i32_0 = arith.constant 0 : i32
    %c0_i32_1 = arith.constant 0 : i32
    return %c0_i32, %c0_i32_0 : i32, i32
  }
  func.func @transform_4(%arg0: i32) -> (i32, i32) {
    %c0_i32 = arith.constant 0 : i32
    %c0_i32_0 = arith.constant 0 : i32
    %c0_i32_1 = arith.constant 0 : i32
    return %c0_i32, %c0_i32_0 : i32, i32
  }
  func.func @transform_5(%arg0: i32) -> (i32, i32) {
    %c0_i32 = arith.constant 0 : i32
    %c0_i32_0 = arith.constant 0 : i32
    %c0_i32_1 = arith.constant 0 : i32
    return %c0_i32, %c0_i32_0 : i32, i32
  }
  func.func @transform_6(%arg0: i32) -> (i32, i32) {
    %c0_i32 = arith.constant 0 : i32
    %c0_i32_0 = arith.constant 0 : i32
    %c0_i32_1 = arith.constant 0 : i32
    return %c0_i32, %c0_i32_0 : i32, i32
  }
  func.func @transform_7(%arg0: i32) -> (i32, i32) {
    %c0_i32 = arith.constant 0 : i32
    %c0_i32_0 = arith.constant 0 : i32
    %c0_i32_1 = arith.constant 0 : i32
    return %c0_i32, %c0_i32_0 : i32, i32
  }
  func.func @transform_8(%arg0: i32) -> (i32, i32) {
    %c0_i32 = arith.constant 0 : i32
    %c0_i32_0 = arith.constant 0 : i32
    %c0_i32_1 = arith.constant 0 : i32
    return %c0_i32, %c0_i32_0 : i32, i32
  }
  func.func @transform_9(%arg0: i32) -> (i32, i32) {
    %c0_i32 = arith.constant 0 : i32
    %c0_i32_0 = arith.constant 0 : i32
    %c0_i32_1 = arith.constant 0 : i32
    return %c0_i32, %c0_i32_0 : i32, i32
  }
  func.func @transform_10(%arg0: i32) -> (i32, i32) {
    %c0_i32 = arith.constant 0 : i32
    %c0_i32_0 = arith.constant 0 : i32
    %c0_i32_1 = arith.constant 0 : i32
    return %c0_i32, %c0_i32_0 : i32, i32
  }
  func.func @transform_11(%arg0: i32) -> (i32, i32) {
    %c0_i32 = arith.constant 0 : i32
    %c0_i32_0 = arith.constant 0 : i32
    return %c0_i32, %arg0 : i32, i32
  }
}

</mosaic_0001>

<bundles_post_ra>
// kernel: tpu_custom_call.1
= control target key start
LH: loop header
LB: loop body
LE: loop exit
PB: predicated region body
PF: predicated region fallthrough
CT: control target
= control target key end

     0   :  { %16 = vsyncpa [#allocation3], 0  ;;  %s2001_s0 = inlined_call_operand.vmem [shape: f32[300,12], index: 0, kind: input, shape index: {}]   ;;  %s2002_s1 = inlined_call_operand.vmem [shape: f32[30,12], index: 1, kind: input, shape index: {}]   ;;  %s2003_s2 = inlined_call_operand.vmem [shape: f32[30,1], index: 2, kind: input, shape index: {}]   ;;  %s2004_s3 = inlined_call_operand.vmem [shape: f32[30,30], index: 3, kind: input, shape index: {}]   ;;  %s2005_s4 = inlined_call_operand.vmem [shape: f32[30,1], index: 4, kind: input, shape index: {}]   ;;  %s2006_s5 = inlined_call_operand.vmem [shape: f32[30,30], index: 5, kind: input, shape index: {}]   ;;  %s2007_s6 = inlined_call_operand.vmem [shape: f32[30,1], index: 6, kind: input, shape index: {}]   ;;  %s2008_s7 = inlined_call_operand.vmem [shape: f32[30,30], index: 7, kind: input, shape index: {}]   ;;  %s2009_s8 = inlined_call_operand.vmem [shape: f32[30,1], index: 8, kind: input, shape index: {}]   ;;  %s2010_s9 = inlined_call_operand.vmem [shape: f32[2,30], index: 9, kind: input, shape index: {}]   ;;  %s2011_s10 = inlined_call_operand.vmem [shape: f32[2,1], index: 10, kind: input, shape index: {}]   ;;  %s2012_s11 = inlined_call_operand.hbm [shape: f32[2,300], index: 11, kind: output, shape index: {}]  }
   0x1   :  { %18 = vsyncpa [#allocation3 + $0x1], 0  ;;  %s1662_s17 = smov 0   ;;  %s1664_s18 = smov 0  }
   0x2   :  { %s1666_s19 = smov 0   ;;  %s1668_s20 = smov 0  }
   0x3 LB: > { %s1683_s21 = sadd.s32 4294967295, %s1596_s20   ;;  %s1288_s22 = sadd.s32 4294967294, %s1596_s20   ;;  %s1596_s20 = sphi %s1668_s20, %s2024_s20   ;;  %s1592_s19 = sphi %s1666_s19, %s2023_s19   ;;  %s1588_s18 = sphi %s1664_s18, %s2022_s18   ;;  %s1584_s17 = sphi %s1662_s17, %s2021_s17  }
   0x4   : > { %s1687_s23 = sadd.s32 1, %s1596_s20   ;;  %s267_s24 = sadd.s32 1, %s1592_s19 }
   0x5   : > { %s264_s25 = ssub.s32 %s1596_s20, %s1687_s23  ;;  %p277_p0 = scmp.ne.s32.totalorder %s1592_s19, %s1588_s18 }
   0x6   : > { %p265_p1 = scmp.eq.s32.totalorder %s264_s25, 0  ;;  %p278_p2 = scmp.eq.s32.totalorder %s1683_s21, 1 }
   0x7   : > { %p283_p3 = scmp.ne.s32.totalorder %s1588_s18, %s1584_s17  ;;  %p284_p4 = scmp.eq.s32.totalorder %s1288_s22, 1 }
   0x8   : > { %s1698_s26 = scalar_select %p265_p1, %s1592_s19, %s267_s24  }
   0x9   : > { %p1700_p5 = por %p278_p2, %p277_p0  ;;  %p1704_p6 = por %p284_p4, %p283_p3 }
   0xa   : > { %2013 = sst [smem:[#allocation5_spill]] %s1698_s26  ;;  %p1291_p7 = scmp.ge.s32.totalorder %s1596_s20, 1 }
   0xb   : > { %p349_p8 = scmp.lt.s32.totalorder %s1596_s20, 3 }
   0xd   : > { %p350_p9 = pnand %p1291_p7, %p349_p8 }
   0xe   : > { %s1293_s29 = sshll.u32 (!%p350_p9), %s1683_s21, 5  ;;  %vm472_vm0 = vcmask (!%p350_p9), 97280   ;;  %v1714_v0 = vld [vmem:[%s2002_s1] sm:$0xff] (!%p350_p9)  ;;  %v1598_v1 = vmov (!%p350_p9), 0   ;;  %v450_v3 = vld [vmem:[%s2003_s2 + $0x10] sm:$0xff] (!%p350_p9)  ;;  %v449_v4 = vld [vmem:[%s2003_s2 + $0x8] sm:$0xff] (!%p350_p9) }
   0xf   : > { %353 = sbr.rel (%p350_p9) target bundleno = 1277 (0x4fd), region = 64  ;;  %p398_p10 = scmp.lt.s32.totalorder (!%p350_p9), %s1293_s29, 37  ;;  %1395 = vmatprep.mubr.msk.f32.mxu0 (!%p350_p9), %vm472_vm0, %v1714_v0  ;;  %1532 = vset.pattern.permute.xlu0 (!%p350_p9), %v1598_v1  ;;  %v448_v2 = vld [vmem:[%s2003_s2] sm:$0xff] (!%p350_p9)  ;;  %v451_v5 = vld [vmem:[%s2003_s2 + $0x18] sm:$0x3f] (!%p350_p9)  ;;  %vm1737_vm1 = vmpackc.low (!%p350_p9), %vm472_vm0, %vm472_vm0  ;;  %vm719_vm2 = vcmask (!%p350_p9), 1045504  }
  0x10   : > { %454 = vperm.xlu0 (!%p350_p9), %1532, %v448_v2   ;;  %1533 = vset.pattern.permute.xlu1 (!%p350_p9), %v1598_v1  ;;  %v682_v7 = vld [vmem:[%s2005_s4] sm:$0xff] (!%p350_p9)  ;;  %v683_v8 = vld [vmem:[%s2005_s4 + $0x8] sm:$0xff] (!%p350_p9)  ;;  %v684_v18 = vld [vmem:[%s2005_s4 + $0x10] sm:$0xff] (!%p350_p9)  ;;  %vm1600_vm3 = vmmov (!%p350_p9), 1   ;;  %vm706_vm5 = vcmask (!%p350_p9), 244736   ;;  %s390_s24 = sand.u32 (!%p350_p9), 1, %s1588_s18  }
  0x11   : > { %464 = vperm.xlu1 (!%p350_p9), %1533, %v450_v3   ;;  %v685_v21 = vld [vmem:[%s2005_s4 + $0x18] sm:$0x3f] (!%p350_p9)  ;;  %v827_v25 = vld [vmem:[%s2007_s6] sm:$0xff] (!%p350_p9)  ;;  %v828_v27 = vld [vmem:[%s2007_s6 + $0x8] sm:$0xff] (!%p350_p9)  ;;  %s1292_s25 = sshll.u32 (!%p350_p9), %s390_s24, 2 }
  0x12   : > { %v829_v28 = vld [vmem:[%s2007_s6 + $0x10] sm:$0xff] (!%p350_p9)  ;;  %v830_v31 = vld [vmem:[%s2007_s6 + $0x18] sm:$0x3f] (!%p350_p9)  ;;  %v970_v35 = vld [vmem:[%s2009_s8] sm:$0xff] (!%p350_p9)  ;;  %s392_s30 = scalar_lea.vmem (!%p350_p9), [#allocation2], %s1292_s25 }
  0x13   : > { %v971_v37 = vld [vmem:[%s2009_s8 + $0x8] sm:$0xff] (!%p350_p9)  ;;  %v972_v38 = vld [vmem:[%s2009_s8 + $0x10] sm:$0xff] (!%p350_p9)  ;;  %v973_v41 = vld [vmem:[%s2009_s8 + $0x18] sm:$0x3f] (!%p350_p9) }
  0x14   : > { %459 = vperm.xlu0 (!%p350_p9), %1532, %v449_v4   ;;  %v1110_v45 = vld [vmem:[%s2011_s10] sm:$0x3] (!%p350_p9)  ;;  %v415_v6 = vld [vmem:[%s2002_s1 + $0x18] sm:$0x3f] (!%p350_p9)  ;;  %vm1862_vm4 = vmpackc.low (!%p350_p9), %vm719_vm2, %vm1600_vm3 }
  0x15   : > { %469 = vperm.xlu1 (!%p350_p9), %1533, %v451_v5   ;;  %v413_v5 = vld [vmem:[%s2002_s1 + $0x8] sm:$0xff] (!%p350_p9) }
  0x16   : > { %s2026_s29 = smov (!%p398_p10, %s1293_s29), 37  ;;  %s1354_s13 = sshll.u32 (%p1700_p5), %s1683_s21, 1 }
  0x17   : > { %s1294_s12 = sshll.u32 %s2026_s29, 3 }
  0x18   : > { %s1733_s14 = scalar_lea.vmem %s2001_s0, %s1294_s12  ;;  %688 = vperm.xlu0 %1532, %v682_v7   ;;  %v414_v7 = vld [vmem:[%s2002_s1 + $0x10] sm:$0xff]  ;;  %s1947_s12 = scalar_lea.sflag [#allocation3], %s390_s24 }
  0x19   : > { %v432_v9 = vld [vmem:[%s1733_s14 + $0x80] sm:$0xff]  ;;  %v433_v10 = vld [vmem:[%s1733_s14 + $0x88] sm:$0xff]  ;;  %v434_v14 = vld [vmem:[%s1733_s14 + $0x90] sm:$0xff]  ;;  %693 = vperm.xlu1 %1533, %v683_v8  }
  0x1a   : > { %v416_v11 = vld [vmem:[%s1733_s14] sm:$0xff]  ;;  %v1403_v12 = vpack.c.bf16 %v433_v10, %v432_v9  ;;  %v417_v13 = vld [vmem:[%s1733_s14 + $0x8] sm:$0xff]  ;;  %v435_v15 = vld [vmem:[%s1733_s14 + $0x98] sm:$0xff] }
  0x1b   : > { %v1406_v16 = vpack.c.bf16 %v417_v13, %v416_v11  ;;  %v1409_v17 = vpack.c.bf16 %v435_v15, %v434_v14  ;;  %v418_v19 = vld [vmem:[%s1733_s14 + $0x10] sm:$0xff]  ;;  %v419_v20 = vld [vmem:[%s1733_s14 + $0x18] sm:$0xff]  ;;  %v436_v22 = vld [vmem:[%s1733_s14 + $0xa0] sm:$0xff] }
  0x1c   : > { %1405 = vmatprep.subr.msk.bf16.mxu0 %vm1737_vm1, %v1403_v12  ;;  %v437_v23 = vld [vmem:[%s1733_s14 + $0xa8] sm:$0xff]  ;;  %698 = vperm.xlu0 %1532, %v684_v18   ;;  %v1412_v24 = vpack.c.bf16 %v419_v20, %v418_v19  ;;  %v420_v29 = vld [vmem:[%s1733_s14 + $0x20] sm:$0xff]  ;;  %v438_v32 = vld [vmem:[%s1733_s14 + $0xb0] sm:$0xff] }
  0x1d   : > { %1408 = vmatpush3.bf16.xpose.msk.msra.mxu0 %vm1737_vm1, %v1406_v16  ;;  %703 = vperm.xlu1 %1533, %v685_v21   ;;  %v1415_v26 = vpack.c.bf16 %v437_v23, %v436_v22  ;;  %v421_v30 = vld [vmem:[%s1733_s14 + $0x28] sm:$0xff]  ;;  %v439_v33 = vld [vmem:[%s1733_s14 + $0xb8] sm:$0xff]  ;;  %v422_v39 = vld [vmem:[%s1733_s14 + $0x30] sm:$0xff] }
  0x1e   : > { %1411 = vmatprep.subr.msk.bf16.mxu0 %vm1737_vm1, %v1409_v17  ;;  %v1418_v34 = vpack.c.bf16 %v421_v30, %v420_v29  ;;  %v1421_v36 = vpack.c.bf16 %v439_v33, %v438_v32  ;;  %v423_v40 = vld [vmem:[%s1733_s14 + $0x38] sm:$0xff]  ;;  %v440_v42 = vld [vmem:[%s1733_s14 + $0xc0] sm:$0xff]  ;;  %v441_v43 = vld [vmem:[%s1733_s14 + $0xc8] sm:$0xff] }
  0x1f   : > { %v1424_v44 = vpack.c.bf16 %v423_v40, %v422_v39  ;;  %v1427_v46 = vpack.c.bf16 %v441_v43, %v440_v42  ;;  %v424_v47 = vld [vmem:[%s1733_s14 + $0x40] sm:$0xff]  ;;  %v425_v48 = vld [vmem:[%s1733_s14 + $0x48] sm:$0xff]  ;;  %v442_v49 = vld [vmem:[%s1733_s14 + $0xd0] sm:$0xff] }
  0x20   : > { %833 = vperm.xlu0 %1532, %v827_v25   ;;  %v443_v50 = vld [vmem:[%s1733_s14 + $0xd8] sm:$0xff]  ;;  %v1430_v51 = vpack.c.bf16 %v425_v48, %v424_v47  ;;  %v426_v53 = vld [vmem:[%s1733_s14 + $0x50] sm:$0xff]  ;;  %v444_v55 = vld [vmem:[%s1733_s14 + $0xe0] sm:$0xff] }
  0x21   : > { %838 = vperm.xlu1 %1533, %v828_v27   ;;  %v1433_v52 = vpack.c.bf16 %v443_v50, %v442_v49  ;;  %v427_v54 = vld [vmem:[%s1733_s14 + $0x58] sm:$0xff]  ;;  %v445_v56 = vld [vmem:[%s1733_s14 + $0xe8] sm:$0xff]  ;;  %v428_v59 = vld [vmem:[%s1733_s14 + $0x60] sm:$0xff] }
  0x22   : > { %v1436_v57 = vpack.c.bf16 %v427_v54, %v426_v53  ;;  %v1439_v58 = vpack.c.bf16 %v445_v56, %v444_v55  ;;  %v429_v60 = vld [vmem:[%s1733_s14 + $0x68] sm:$0xff]  ;;  %v446_v61 = vld [vmem:[%s1733_s14 + $0xf0] sm:$0xff]  ;;  %v447_v62 = vld [vmem:[%s1733_s14 + $0xf8] sm:$0xff] }
  0x23   : > { %v1442_v63 = vpack.c.bf16 %v429_v60, %v428_v59  ;;  %v1445_v1 = vpack.c.bf16 %v447_v62, %v446_v61  ;;  %v430_v2 = vld [vmem:[%s1733_s14 + $0x70] sm:$0xff]  ;;  %v431_v3 = vld [vmem:[%s1733_s14 + $0x78] sm:$0xff]  ;;  %v679_v42 = vld [vmem:[%s2004_s3 + $0x8] sm:$0xff]  ;;  %s1217_s14 = ssub.s32 (%p1700_p5), 3, %s1354_s13 }
  0x24   : > { %843 = vperm.xlu0 %1532, %v829_v28   ;;  %v1448_v4 = vpack.c.bf16 %v431_v3, %v430_v2  ;;  %v680_v43 = vld [vmem:[%s2004_s3 + $0x10] sm:$0xff]  ;;  %p1218_p11 = scmp.lt.s32.totalorder (%p1700_p5), %s1217_s14, 2 }
  0x25   : > { %1414 = vmatpush3.bf16.xpose.msk.msra.mxu0 %vm1737_vm1, %v1412_v24  ;;  %848 = vperm.xlu1 %1533, %v830_v31  }
  0x26   : > { %1417 = vmatprep.subr.msk.bf16.mxu0 %vm1737_vm1, %v1415_v26 }
  0x28   : > { %976 = vperm.xlu0 %1532, %v970_v35  }
  0x29   : > { %981 = vperm.xlu1 %1533, %v971_v37  }
  0x2c   : > { %986 = vperm.xlu0 %1532, %v972_v38  }
  0x2d   : > { %1420 = vmatpush3.bf16.xpose.msk.msra.mxu0 %vm1737_vm1, %v1418_v34  ;;  %991 = vperm.xlu1 %1533, %v973_v41   ;;  %v678_v41 = vld [vmem:[%s2004_s3] sm:$0xff] }
  0x2e   : > { %1423 = vmatprep.subr.msk.bf16.mxu0 %vm1737_vm1, %v1421_v36 }
  0x30   : > { %1113 = vperm.xlu0 %1532, %v1110_v45  }
  0x35   : > { %1426 = vmatpush3.bf16.xpose.msk.msra.mxu0 %vm1737_vm1, %v1424_v44  ;;  %v681_v44 = vld [vmem:[%s2004_s3 + $0x18] sm:$0x3f] }
  0x36   : > { %1429 = vmatprep.subr.msk.bf16.mxu0 %vm1737_vm1, %v1427_v46 }
  0x3d   : > { %1432 = vmatpush3.bf16.xpose.msk.msra.mxu0 %vm1737_vm1, %v1430_v51 }
  0x3e   : > { %1435 = vmatprep.subr.msk.bf16.mxu0 %vm1737_vm1, %v1433_v52 }
  0x45   : > { %1438 = vmatpush3.bf16.xpose.msk.msra.mxu0 %vm1737_vm1, %v1436_v57 }
  0x46   : > { %1441 = vmatprep.subr.msk.bf16.mxu0 %vm1737_vm1, %v1439_v58 }
  0x4d   : > { %1444 = vmatpush3.bf16.xpose.msk.msra.mxu0 %vm1737_vm1, %v1442_v63 }
  0x4e   : > { %1447 = vmatprep.subr.msk.bf16.mxu0 %vm1737_vm1, %v1445_v1 }
  0x55   : > { %1450 = vmatpush3.bf16.xpose.msk.msra.mxu0 %vm1737_vm1, %v1448_v4 }
  0x5c   : > { %1396 = vmatmul.mubr.msk.f32.vlgmr.msra.gmra.mrb[0].mxu0 %vm472_vm0, %v1714_v0  ;;  %v1599_v0 = vmov 0.0  }
  0x5d   : > { %1397 = vmatprep.mubr.msk.f32.mxu0 %vm472_vm0, %v413_v5  ;;  %790 = vmatprep.mubr.f32.mxu1 %v1599_v0 }
  0x60   : > { %1398 = vmatmul.mubr.msk.f32.gmra.mrb[2].mxu0 %vm472_vm0, %v413_v5 }
  0x61   : > { %1399 = vmatprep.mubr.msk.f32.mxu0 %vm472_vm0, %v414_v7 }
  0x64   : > { %1400 = vmatmul.mubr.msk.f32.gmra.mrb[4].mxu0 %vm472_vm0, %v414_v7 }
  0x65   : > { %1401 = vmatprep.mubr.msk.f32.mxu0 %vm472_vm0, %v415_v6 }
  0x68   : > { %1402 = vmatmul.mubr.msk.f32.gmra.mrb[6].mxu0 %vm472_vm0, %v415_v6 }
  0x8f   : > { %v455_v8 = vpop.permute.xlu0 %454 }
  0x90   : > { %v465_v17 = vpop.permute.xlu1 %464 }
  0x93   : > { %v460_v12 = vpop.permute.xlu0 %459 }
  0x94   : > { %v470_v28 = vpop.permute.xlu1 %469 }
  0x97   : > { %v689_v47 = vpop.permute.xlu0 %688 }
  0x98   : > { %v694_v49 = vpop.permute.xlu1 %693 }
  0x9b   : > { %v699_v62 = vpop.permute.xlu0 %698 }
  0x9c   : > { %v704_v2 = vpop.permute.xlu1 %703 }
 0x12f   : > { %v647_v9 = vpop.f32.mrb[0].mxu0 }
 0x130   : > { %v649_v10 = vpop.f32.mrb[1].mxu0  ;;  %v648_v11 = vadd.f32 %v647_v9, %v455_v8 }
 0x131   : > { %v650_v13 = vadd.f32 %v649_v10, %v455_v8 }
 0x132   : > { %v670_v19 = vmax.f32 %v648_v11, 0.0 }
 0x133   : > { %v653_v14 = vpop.f32.mrb[2].mxu0  ;;  %v671_v21 = vmax.f32 %v650_v13, 0.0 }
 0x134   : > { %v654_v15 = vadd.f32 %v653_v14, %v460_v12  ;;  %v655_v16 = vpop.f32.mrb[3].mxu0  ;;  %v823_v14 = vld [vmem:[%s2006_s5] sm:$0xff] }
 0x135   : > { %v656_v18 = vadd.f32 %v655_v16, %v460_v12  ;;  %v825_v16 = vld [vmem:[%s2006_s5 + $0x10] sm:$0xff] }
 0x136   : > { %v672_v20 = vmax.f32 %v654_v15, 0.0  ;;  %v824_v15 = vld [vmem:[%s2006_s5 + $0x8] sm:$0xff] }
 0x137   : > { %v673_v22 = vmax.f32 %v656_v18, 0.0  ;;  %v659_v23 = vpop.f32.mrb[4].mxu0 }
 0x138   : > { %v661_v24 = vpop.f32.mrb[5].mxu0  ;;  %v1453_v25 = vpack.c.bf16 %v672_v20, %v670_v19  ;;  %v660_v27 = vadd.f32 %v659_v23, %v465_v17  ;;  %v834_v20 = vpop.permute.xlu0 %833 }
 0x139   : > { %v1451_v26 = vpack.c.bf16 %v673_v22, %v671_v21  ;;  %v662_v29 = vadd.f32 %v661_v24, %v465_v17  ;;  %v826_v17 = vld [vmem:[%s2006_s5 + $0x18] sm:$0x3f]  ;;  %v839_v22 = vpop.permute.xlu1 %838 }
 0x13a   : > { %v674_v34 = vmax.f32 %v660_v27, 0.0 }
 0x13b   : > { %v665_v30 = vpop.f32.mrb[6].mxu0  ;;  %1452 = vmatprep.subr.bf16.mxu1 %v1451_v26  ;;  %v675_v36 = vmax.f32 %v662_v29, 0.0 }
 0x13c   : > { %v666_v31 = vadd.f32 %v665_v30, %v470_v28  ;;  %v667_v32 = vpop.f32.mrb[7].mxu0  ;;  %1454 = vmatpush1.bf16.msra.mxu1 %v1453_v25 }
 0x13d   : > { %v668_v33 = vadd.f32 %v667_v32, %v470_v28 }
 0x13e   : > { %v676_v35 = vmax.f32 %v666_v31, 0.0 }
 0x13f   : > { %v677_v37 = vmax.f32 %v668_v33, 0.0 }
 0x140   : > { %v1458_v38 = vpack.c.bf16 %v676_v35, %v674_v34  ;;  %v844_v35 = vpop.permute.xlu0 %843 }
 0x141   : > { %v1455_v40 = vpack.c.bf16 %v677_v37, %v675_v36 }
 0x143   : > { %1457 = vmatprep.subr.msk.bf16.mxu1 %vm1862_vm4, %v1455_v40 }
 0x144   : > { %1460 = vmatpush1.bf16.msk.msra.mxu1 %vm1862_vm4, %v1458_v38  ;;  %v849_v38 = vpop.permute.xlu1 %848 }
 0x147   : > { %1333 = vmatmul.mubr.msk.f32.vlgmr.msra.gmra.mrb[0].mxu1 %vm706_vm5, %v678_v41 }
 0x148   : > { %796 = vmatprep.mubr.f32.mxu1 %v1599_v0 }
 0x14b   : > { %1334 = vmatmul.mubr.msk.f32.gmra.mrb[2].mxu1 %vm706_vm5, %v679_v42 }
 0x14c   : > { %802 = vmatprep.mubr.f32.mxu1 %v1599_v0 }
 0x14f   : > { %1335 = vmatmul.mubr.msk.f32.gmra.mrb[4].mxu1 %vm706_vm5, %v680_v43 }
 0x150   : > { %808 = vmatprep.mubr.f32.mxu1 %v1599_v0 }
 0x153   : > { %1336 = vmatmul.mubr.msk.f32.gmra.mrb[6].mxu1 %vm706_vm5, %v681_v44 }
 0x154   : > { %933 = vmatprep.mubr.f32.mxu1 %v1599_v0 }
 0x21a   : > { %v792_v45 = vpop.f32.mrb[0].mxu1 }
 0x21b   : > { %v794_v46 = vpop.f32.mrb[1].mxu1  ;;  %v793_v48 = vadd.f32 %v792_v45, %v689_v47 }
 0x21c   : > { %v795_v50 = vadd.f32 %v794_v46, %v689_v47 }
 0x21d   : > { %v815_v55 = vmax.f32 %v793_v48, 0.0 }
 0x21e   : > { %v798_v51 = vpop.f32.mrb[2].mxu1  ;;  %v816_v57 = vmax.f32 %v795_v50, 0.0 }
 0x21f   : > { %v799_v52 = vadd.f32 %v798_v51, %v694_v49  ;;  %v800_v53 = vpop.f32.mrb[3].mxu1  ;;  %v966_v51 = vld [vmem:[%s2008_s7] sm:$0xff] }
 0x220   : > { %v801_v54 = vadd.f32 %v800_v53, %v694_v49  ;;  %v968_v53 = vld [vmem:[%s2008_s7 + $0x10] sm:$0xff] }
 0x221   : > { %v817_v56 = vmax.f32 %v799_v52, 0.0  ;;  %v967_v52 = vld [vmem:[%s2008_s7 + $0x8] sm:$0xff] }
 0x222   : > { %v818_v58 = vmax.f32 %v801_v54, 0.0  ;;  %v804_v59 = vpop.f32.mrb[4].mxu1  ;;  %v969_v54 = vld [vmem:[%s2008_s7 + $0x18] sm:$0x3f] }
 0x223   : > { %v1463_v60 = vpack.c.bf16 %v817_v56, %v815_v55  ;;  %v806_v61 = vpop.f32.mrb[5].mxu1  ;;  %v805_v1 = vadd.f32 %v804_v59, %v699_v62  ;;  %v982_v59 = vpop.permute.xlu1 %981 }
 0x224   : > { %v1461_v63 = vpack.c.bf16 %v818_v58, %v816_v57  ;;  %v807_v3 = vadd.f32 %v806_v61, %v699_v62  ;;  %v977_v57 = vpop.permute.xlu0 %976 }
 0x225   : > { %v819_v8 = vmax.f32 %v805_v1, 0.0 }
 0x226   : > { %v810_v4 = vpop.f32.mrb[6].mxu1  ;;  %1462 = vmatprep.subr.bf16.mxu1 %v1461_v63  ;;  %v820_v10 = vmax.f32 %v807_v3, 0.0 }
 0x227   : > { %v811_v5 = vadd.f32 %v810_v4, %v704_v2  ;;  %v812_v7 = vpop.f32.mrb[7].mxu1  ;;  %1464 = vmatpush1.bf16.msra.mxu1 %v1463_v60 }
 0x228   : > { %v813_v6 = vadd.f32 %v812_v7, %v704_v2 }
 0x229   : > { %v821_v9 = vmax.f32 %v811_v5, 0.0 }
 0x22a   : > { %v822_v11 = vmax.f32 %v813_v6, 0.0 }
 0x22b   : > { %v1468_v12 = vpack.c.bf16 %v821_v9, %v819_v8  ;;  %v987_v9 = vpop.permute.xlu0 %986 }
 0x22c   : > { %v1465_v13 = vpack.c.bf16 %v822_v11, %v820_v10  ;;  %v992_v11 = vpop.permute.xlu1 %991 }
 0x22e   : > { %1467 = vmatprep.subr.msk.bf16.mxu1 %vm1862_vm4, %v1465_v13 }
 0x22f   : > { %1470 = vmatpush1.bf16.msk.msra.mxu1 %vm1862_vm4, %v1468_v12 }
 0x232   : > { %1339 = vmatmul.mubr.msk.f32.vlgmr.msra.gmra.mrb[8].mxu1 %vm706_vm5, %v823_v14 }
 0x233   : > { %939 = vmatprep.mubr.f32.mxu1 %v1599_v0 }
 0x236   : > { %1340 = vmatmul.mubr.msk.f32.gmra.mrb[10].mxu1 %vm706_vm5, %v824_v15 }
 0x237   : > { %945 = vmatprep.mubr.f32.mxu1 %v1599_v0 }
 0x23a   : > { %1341 = vmatmul.mubr.msk.f32.gmra.mrb[12].mxu1 %vm706_vm5, %v825_v16 }
 0x23b   : > { %951 = vmatprep.mubr.f32.mxu1 %v1599_v0 }
 0x23e   : > { %1342 = vmatmul.mubr.msk.f32.gmra.mrb[14].mxu1 %vm706_vm5, %v826_v17 }
 0x23f   : > { %1076 = vmatprep.mubr.f32.mxu1 %v1599_v0 }
 0x305   : > { %v935_v18 = vpop.f32.mrb[8].mxu1 }
 0x306   : > { %v937_v19 = vpop.f32.mrb[9].mxu1  ;;  %v936_v21 = vadd.f32 %v935_v18, %v834_v20 }
 0x307   : > { %v938_v23 = vadd.f32 %v937_v19, %v834_v20 }
 0x308   : > { %v958_v28 = vmax.f32 %v936_v21, 0.0 }
 0x309   : > { %v941_v24 = vpop.f32.mrb[10].mxu1  ;;  %v959_v30 = vmax.f32 %v938_v23, 0.0  ;;  %v1109_v23 = vld [vmem:[%s2010_s9] sm:$0x3] }
 0x30a   : > { %v942_v25 = vadd.f32 %v941_v24, %v839_v22  ;;  %v943_v26 = vpop.f32.mrb[11].mxu1  ;;  %v1114_v24 = vpop.permute.xlu0 %1113 }
 0x30b   : > { %v944_v27 = vadd.f32 %v943_v26, %v839_v22 }
 0x30c   : > { %v960_v29 = vmax.f32 %v942_v25, 0.0 }
 0x30d   : > { %v961_v31 = vmax.f32 %v944_v27, 0.0  ;;  %v947_v32 = vpop.f32.mrb[12].mxu1 }
 0x30e   : > { %v1473_v33 = vpack.c.bf16 %v960_v29, %v958_v28  ;;  %v949_v34 = vpop.f32.mrb[13].mxu1  ;;  %v948_v37 = vadd.f32 %v947_v32, %v844_v35 }
 0x30f   : > { %v1471_v36 = vpack.c.bf16 %v961_v31, %v959_v30  ;;  %v950_v40 = vadd.f32 %v949_v34, %v844_v35 }
 0x310   : > { %v962_v45 = vmax.f32 %v948_v37, 0.0 }
 0x311   : > { %v953_v41 = vpop.f32.mrb[14].mxu1  ;;  %1472 = vmatprep.subr.bf16.mxu1 %v1471_v36  ;;  %v963_v47 = vmax.f32 %v950_v40, 0.0 }
 0x312   : > { %v954_v42 = vadd.f32 %v953_v41, %v849_v38  ;;  %v955_v43 = vpop.f32.mrb[15].mxu1  ;;  %1474 = vmatpush1.bf16.msra.mxu1 %v1473_v33 }
 0x313   : > { %v956_v44 = vadd.f32 %v955_v43, %v849_v38 }
 0x314   : > { %v964_v46 = vmax.f32 %v954_v42, 0.0 }
 0x315   : > { %v965_v48 = vmax.f32 %v956_v44, 0.0 }
 0x316   : > { %v1478_v49 = vpack.c.bf16 %v964_v46, %v962_v45 }
 0x317   : > { %v1475_v50 = vpack.c.bf16 %v965_v48, %v963_v47 }
 0x319   : > { %1477 = vmatprep.subr.msk.bf16.mxu1 %vm1862_vm4, %v1475_v50 }
 0x31a   : > { %1480 = vmatpush1.bf16.msk.msra.mxu1 %vm1862_vm4, %v1478_v49 }
 0x31d   : > { %1345 = vmatmul.mubr.msk.f32.vlgmr.msra.gmra.mrb[16].mxu1 %vm706_vm5, %v966_v51 }
 0x31e   : > { %1082 = vmatprep.mubr.f32.mxu1 %v1599_v0 }
 0x321   : > { %1346 = vmatmul.mubr.msk.f32.gmra.mrb[18].mxu1 %vm706_vm5, %v967_v52 }
 0x322   : > { %1088 = vmatprep.mubr.f32.mxu1 %v1599_v0 }
 0x325   : > { %1347 = vmatmul.mubr.msk.f32.gmra.mrb[20].mxu1 %vm706_vm5, %v968_v53 }
 0x326   : > { %1094 = vmatprep.mubr.f32.mxu1 %v1599_v0 }
 0x329   : > { %1348 = vmatmul.mubr.msk.f32.gmra.mrb[22].mxu1 %vm706_vm5, %v969_v54 }
 0x32a   : > { %1189 = vmatprep.mubr.f32.mxu1 %v1599_v0 }
 0x3f0   : > { %v1078_v55 = vpop.f32.mrb[16].mxu1 }
 0x3f1   : > { %v1080_v56 = vpop.f32.mrb[17].mxu1  ;;  %v1079_v58 = vadd.f32 %v1078_v55, %v977_v57 }
 0x3f2   : > { %v1081_v60 = vadd.f32 %v1080_v56, %v977_v57 }
 0x3f3   : > { %v1101_v2 = vmax.f32 %v1079_v58, 0.0 }
 0x3f4   : > { %v1084_v61 = vpop.f32.mrb[18].mxu1  ;;  %v1102_v4 = vmax.f32 %v1081_v60, 0.0 }
 0x3f5   : > { %v1085_v62 = vadd.f32 %v1084_v61, %v982_v59  ;;  %v1086_v63 = vpop.f32.mrb[19].mxu1 }
 0x3f6   : > { %v1087_v1 = vadd.f32 %v1086_v63, %v982_v59 }
 0x3f7   : > { %v1103_v3 = vmax.f32 %v1085_v62, 0.0 }
 0x3f8   : > { %v1104_v5 = vmax.f32 %v1087_v1, 0.0  ;;  %v1090_v7 = vpop.f32.mrb[20].mxu1 }
 0x3f9   : > { %v1483_v6 = vpack.c.bf16 %v1103_v3, %v1101_v2  ;;  %v1092_v8 = vpop.f32.mrb[21].mxu1  ;;  %v1091_v0 = vadd.f32 %v1090_v7, %v987_v9 }
 0x3fa   : > { %v1481_v10 = vpack.c.bf16 %v1104_v5, %v1102_v4  ;;  %v1093_v12 = vadd.f32 %v1092_v8, %v987_v9 }
 0x3fb   : > { %v1105_v17 = vmax.f32 %v1091_v0, 0.0 }
 0x3fc   : > { %v1096_v13 = vpop.f32.mrb[22].mxu1  ;;  %1482 = vmatprep.subr.bf16.mxu1 %v1481_v10  ;;  %v1106_v19 = vmax.f32 %v1093_v12, 0.0 }
 0x3fd   : > { %v1097_v14 = vadd.f32 %v1096_v13, %v992_v11  ;;  %v1098_v15 = vpop.f32.mrb[23].mxu1  ;;  %1484 = vmatpush1.bf16.msra.mxu1 %v1483_v6 }
 0x3fe   : > { %v1099_v16 = vadd.f32 %v1098_v15, %v992_v11 }
 0x3ff   : > { %v1107_v18 = vmax.f32 %v1097_v14, 0.0 }
 0x400   : > { %v1108_v20 = vmax.f32 %v1099_v16, 0.0 }
 0x401   : > { %v1488_v21 = vpack.c.bf16 %v1107_v18, %v1105_v17 }
 0x402   : > { %v1485_v22 = vpack.c.bf16 %v1108_v20, %v1106_v19 }
 0x404   : > { %1487 = vmatprep.subr.msk.bf16.mxu1 %vm1862_vm4, %v1485_v22 }
 0x405   : > { %1490 = vmatpush1.bf16.msk.msra.mxu1 %vm1862_vm4, %v1488_v21 }
 0x408   : > { %1351 = vmatmul.mubr.msk.f32.vlgmr.msra.gmra.mrb[24].mxu1 %vm706_vm5, %v1109_v23 }
 0x4db   : > { %v1191_v25 = vpop.f32.mrb[24].mxu1  ;;  %1215 = sbr.rel (!%p1700_p5) target bundleno = 1277 (0x4fd), region = 68 }
 0x4dc   : > { %v1192_v26 = vadd.f32 %v1191_v25, %v1114_v24  ;;  %v1193_v27 = vpop.f32.mrb[25].mxu1 }
 0x4dd   : > { %v1194_v28 = vadd.f32 %v1193_v27, %v1114_v24 }
 0x4df   : > { %v1198_v29 = vcombine.low %v1192_v26, %v1194_v28 }
 0x4e1   : > { %1352 = vst.sshfl [vmem:[%s392_s30] sm:$0x33 pattern:$0x76325410] %v1198_v29 }
 0x4e2   : > { %s2028_s14 = smov (!%p1218_p11, %s1217_s14), 2 }
 0x4e3   : > { %s1952_s15 = sshll.u32 %s2028_s14, 5 }
 0x4e4   : > { %s1222_s29 = ssub.s32 64, %s1952_s15 }
 0x4e5   : > { %1223 = vsyncadd %s1947_s12, %s1222_s29  ;;  %p1356_p12 = scmp.ne.s32.totalorder %s1952_s15, 0  ;;  %s1362_s26 = sshll.u32 %s1683_s21, 6 }
 0x4e6   : > { %s1961_s22 = scalar_lea.hbm %s2012_s11, %s1362_s26  ;;  %s1229_s24 = sshll.u32 %s392_s30, 4  ;;  %s1230_s24 = int_to_ptr.vmem [resolvable:$true] %s1229_s24 }
 0x4e7   : > { %s1534_s25 = scalar_lea.vmem %s1230_s24, %s1952_s15  ;;  %s1601_s13 = smov [#allocation2]  }
 0x4e8   : > { %p1535_p13 = scmp.ne.s32.totalorder %s1230_s24, %s1534_s25  ;;  %s1538_s14 = sshll.u32 %s1601_s13, 4  ;;  %s1539_s14 = int_to_ptr.vmem [resolvable:$false] %s1538_s14 }
 0x4e9   : > { %s1540_s29 = scalar_lea.vmem %s1539_s14, 128  ;;  %p1541_p2 = scmp.lt.s32.totalorder %s1230_s24, %s1539_s14 }
 0x4ea   : > { %p1536_p0 = pnand %p1535_p13, %p1356_p12  ;;  %p1542_p3 = scmp.lt.s32.totalorder %s1540_s29, %s1534_s25 }
 0x4ec   : > { %p1537_p1 = pneg %p1536_p0  ;;  %p1543_p4 = por %p1542_p3, %p1541_p2 }
 0x4ee   : > { %p1544_p5 = pnand %p1543_p4, %p1537_p1 }
 0x4f0   : > { %1547 = shalt.err (!%p1544_p5)
}
 0x4f1   : > { %s1548_s21 = scalar_lea.hbm %s1961_s22, %s1952_s15  ;;  %s1552_s16 = scalar_lea.hbm %s2012_s11, 96 }
 0x4f2   : > { %p1549_p7 = scmp.ne.s32.totalorder %s1961_s22, %s1548_s21  ;;  %p1553_p10 = scmp.lt.u32.totalorder %s1961_s22, %s2012_s11 }
 0x4f3   : > { %p1554_p11 = scmp.lt.u32.totalorder %s1552_s16, %s1548_s21  ;;  %p1556_p0 = scmp.lt.u32.totalorder %s1548_s21, %s1961_s22 }
 0x4f4   : > { %p1550_p8 = pnand %p1549_p7, %p1356_p12 }
 0x4f5   : > { %p1555_p13 = por %p1554_p11, %p1553_p10 }
 0x4f6   : > { %p1551_p9 = pneg %p1550_p8 }
 0x4f7   : > { %p1557_p1 = por %p1556_p0, %p1555_p13 }
 0x4f9   : > { %p1558_p2 = pnand %p1557_p1, %p1551_p9 }
 0x4fb   : > { %1561 = shalt.err (!%p1558_p2)
}
 0x4fc   : > { %1232 = dma.vmem_to_hbm [thread:$0]  (%p1356_p12), %s1230_s24, %s1952_s15, %s1961_s22, %s1947_s12  }
 0x4fd PF: > { %p1496_p3 = scmp.ge.s32.totalorder %s1596_s20, 2  ;;  %s1241_s13 = sand.u32 1, %s1584_s17  }
 0x4fe   : > { %s1242_s14 = scalar_lea.sflag [#allocation3], %s1241_s13 }
 0x4ff   : > { %p1493_p4 = pnand %p1496_p3, %p1704_p6 }
 0x501   : > { %1579 = dma.done.wait (!%p1493_p4), %s1242_s14, 64  }
 0x502   : > { %1581 = vsyncadd (!%p1493_p4), %s1242_s14, 4294967232  ;;  %s2020_s29 = sld [smem:[#allocation5_spill]]  ;;  %p21_p5 = scmp.ge.s32.totalorder %s1687_s23, 4  }
 0x503   : > { %s2021_s17 = smov %s1588_s18  ;;  %s2022_s18 = smov %s1592_s19 }
 0x504   : > { %s2024_s20 = smov %s1687_s23  ;;  %23 = sbr.rel (!%p21_p5) target bundleno = 3 (0x3), region = 99 }
 0x508   : > { %s2023_s19 = smov %s2020_s29 }
 0x50b   :  { %1247 = vsyncpa [#allocation3], 1 }
 0x50c   :  { %1249 = vsyncpa [#allocation3 + $0x1], 1 }

</bundles_post_ra>
